<compile_context>
chip_gen: v6e
topology: v6e:2x2x1
jax: 0.10.0
libtpu: 0.0.40
codegen_flags: <defaults>
</compile_context>

<pallas_src>
import math

import jax
import jax.numpy as jnp
from jax.experimental import pallas as pl
from jax.experimental.pallas import tpu as pltpu


# ----------------------------------------------------------------------------
# Pallas kernel
# ----------------------------------------------------------------------------

def _make_concat_kernel(channels):
    """Kernel writing each input block into its (static) channel window."""
    offsets = []
    off = 0
    for c in channels:
        offsets.append(off)
        off += c

    def kernel(*refs):
        *in_refs, o_ref = refs
        for r, o, c in zip(in_refs, offsets, channels):
            # Static channel-window store; lane axis (last dim) is dense.
            o_ref[:, o:o + c, :] = r[...]

    return kernel


def _choose_lane_tile(S, c_total, itemsize):
    """Largest lane tile that divides S, is a multiple of 128, and keeps the
    per-step VMEM footprint (inputs + output, double buffered) under ~8 MiB."""
    if S % 128 != 0:
        # Full-extent lane block is always legal (block dim == array dim).
        return S
    budget = 8 * 1024 * 1024
    cap = max(128, budget // max(1, 4 * c_total * itemsize))
    best = 128
    cand = 128
    while cand <= S:
        if S % cand == 0 and cand <= cap:
            best = cand
        cand += 128
    return best


# ----------------------------------------------------------------------------
# Wrapper: torch.cat(x, dim) semantics
# ----------------------------------------------------------------------------

def concat_pallas(xs, dim=1):
    """Concatenate a sequence of arrays along `dim` (default 1), like torch.cat."""
    xs = list(xs)
    assert len(xs) >= 1, "Concat needs at least one input"
    if len(xs) == 1:
        return xs[0]

    rank = xs[0].ndim
    d = dim % rank
    dtype = xs[0].dtype
    for x in xs:
        assert x.ndim == rank, "all inputs must have the same rank"
        assert x.dtype == dtype, "all inputs must share a dtype"
        for ax in range(rank):
            if ax != d:
                assert x.shape[ax] == xs[0].shape[ax], \
                    "non-concat dims must match"

    lead = xs[0].shape[:d]
    trail = xs[0].shape[d + 1:]
    B = int(math.prod(lead)) if lead else 1          # collapsed leading dims
    S = int(math.prod(trail)) if trail else 1        # collapsed trailing dims
    channels = [int(x.shape[d]) for x in xs]
    c_total = sum(channels)

    # View every input as (B, C_i, S): concat axis in the middle, trailing
    # dims on the 128-lane axis.
    x3 = [x.reshape(B, c, S) for x, c in zip(xs, channels)]

    ts = _choose_lane_tile(S, c_total, jnp.dtype(dtype).itemsize)
    n_s = S // ts
    grid = (B, n_s)

    in_specs = [
        pl.BlockSpec((1, c, ts), lambda b, s: (b, 0, s)) for c in channels
    ]
    out_specs = pl.BlockSpec((1, c_total, ts), lambda b, s: (b, 0, s))

    out = pl.pallas_call(
        _make_concat_kernel(channels),
        out_shape=jax.ShapeDtypeStruct((B, c_total, S), dtype),
        grid=grid,
        in_specs=in_specs,
        out_specs=out_specs,
        compiler_params=pltpu.CompilerParams(
            dimension_semantics=("parallel", "parallel")),
    )(*x3)

    return out.reshape(*lead, c_total, *trail)


# ----------------------------------------------------------------------------
# Demo / self-check
# ----------------------------------------------------------------------------

if __name__ == "__main__":
    key = jax.random.PRNGKey(0)

    # --- case 1: NCHW f32, torch.cat(dim=1) -------------------------------
    B, H, W = 2, 16, 16
    x0 = jax.random.normal(jax.random.fold_in(key, 1), (B, 4, H, W), jnp.float32)
    x1 = jax.random.normal(jax.random.fold_in(key, 2), (B, 8, H, W), jnp.float32)
    x2 = jax.random.normal(jax.random.fold_in(key, 3), (B, 4, H, W), jnp.float32)

    fwd = jax.jit(lambda *ts: concat_pallas(ts, dim=1))
    out = fwd(x0, x1, x2)
    jax.block_until_ready(out)

    ref = jnp.concatenate([x0, x1, x2], axis=1)
    assert out.shape == (B, 16, H, W), out.shape
    assert out.dtype == jnp.float32
    assert bool(jnp.array_equal(out, ref)), "mismatch vs jnp.concatenate (f32)"

    # --- case 2: bf16, spatial size not a multiple of 128 (full-lane path) --
    y0 = jax.random.normal(jax.random.fold_in(key, 4), (2, 6, 8, 8)).astype(jnp.bfloat16)
    y1 = jax.random.normal(jax.random.fold_in(key, 5), (2, 10, 8, 8)).astype(jnp.bfloat16)

    out2 = jax.jit(lambda a, b: concat_pallas([a, b], dim=1))(y0, y1)
    jax.block_until_ready(out2)

    ref2 = jnp.concatenate([y0, y1], axis=1)
    assert out2.shape == (2, 16, 8, 8), out2.shape
    assert out2.dtype == jnp.bfloat16
    assert bool(jnp.array_equal(out2, ref2)), "mismatch vs jnp.concatenate (bf16)"

    print("KERNEL_OK")
</pallas_src>

<mosaic_0001>
module attributes {stable_mosaic.version = 11 : i64} {
  func.func @kernel(%arg0: i32, %arg1: i32, %arg2: memref<1x4x256xf32, #tpu.memory_space<vmem>>, %arg3: memref<1x8x256xf32, #tpu.memory_space<vmem>>, %arg4: memref<1x4x256xf32, #tpu.memory_space<vmem>>, %arg5: memref<1x16x256xf32, #tpu.memory_space<vmem>>) attributes {dimension_semantics = [#tpu.dimension_semantics<parallel>, #tpu.dimension_semantics<parallel>], iteration_bounds = array<i64: 2, 1>, scalar_prefetch = 0 : i64, scratch_operands = 0 : i64, tpu.core_type = #tpu.core_type<tc>, window_params = [{transform_indices = @transform_0, window_bounds = array<i64: 1, 4, 256>}, {transform_indices = @transform_1, window_bounds = array<i64: 1, 8, 256>}, {transform_indices = @transform_2, window_bounds = array<i64: 1, 4, 256>}, {transform_indices = @transform_3, window_bounds = array<i64: 1, 16, 256>}]} {
    %c0 = arith.constant 0 : index
    %c0_0 = arith.constant 0 : index
    %c0_1 = arith.constant 0 : index
    %0 = vector.load %arg2[%c0, %c0_0, %c0_1] : memref<1x4x256xf32, #tpu.memory_space<vmem>>, vector<1x4x256xf32>
    %c0_2 = arith.constant 0 : index
    %c0_3 = arith.constant 0 : index
    %c0_4 = arith.constant 0 : index
    %1 = vector.load %arg5[%c0_2, %c0_3, %c0_4] : memref<1x16x256xf32, #tpu.memory_space<vmem>>, vector<1x4x256xf32>
    tpu.vector_store %arg5[%c0_2, %c0_3, %c0_4], %0 {strides = array<i32>} : memref<1x16x256xf32, #tpu.memory_space<vmem>>, vector<1x4x256xf32>,
    %c0_5 = arith.constant 0 : index
    %c0_6 = arith.constant 0 : index
    %c0_7 = arith.constant 0 : index
    %2 = vector.load %arg3[%c0_5, %c0_6, %c0_7] : memref<1x8x256xf32, #tpu.memory_space<vmem>>, vector<1x8x256xf32>
    %c0_8 = arith.constant 0 : index
    %c4 = arith.constant 4 : index
    %c0_9 = arith.constant 0 : index
    %3 = vector.load %arg5[%c0_8, %c4, %c0_9] : memref<1x16x256xf32, #tpu.memory_space<vmem>>, vector<1x8x256xf32>
    tpu.vector_store %arg5[%c0_8, %c4, %c0_9], %2 {strides = array<i32>} : memref<1x16x256xf32, #tpu.memory_space<vmem>>, vector<1x8x256xf32>,
    %c0_10 = arith.constant 0 : index
    %c0_11 = arith.constant 0 : index
    %c0_12 = arith.constant 0 : index
    %4 = vector.load %arg4[%c0_10, %c0_11, %c0_12] : memref<1x4x256xf32, #tpu.memory_space<vmem>>, vector<1x4x256xf32>
    %c0_13 = arith.constant 0 : index
    %c12 = arith.constant 12 : index
    %c0_14 = arith.constant 0 : index
    %5 = vector.load %arg5[%c0_13, %c12, %c0_14] : memref<1x16x256xf32, #tpu.memory_space<vmem>>, vector<1x4x256xf32>
    tpu.vector_store %arg5[%c0_13, %c12, %c0_14], %4 {strides = array<i32>} : memref<1x16x256xf32, #tpu.memory_space<vmem>>, vector<1x4x256xf32>,
    return
  }
  func.func @transform_0(%arg0: i32, %arg1: i32) -> (i32, i32, i32) {
    %c0_i32 = arith.constant 0 : i32
    %c0_i32_0 = arith.constant 0 : i32
    return %arg0, %c0_i32, %arg1 : i32, i32, i32
  }
  func.func @transform_1(%arg0: i32, %arg1: i32) -> (i32, i32, i32) {
    %c0_i32 = arith.constant 0 : i32
    %c0_i32_0 = arith.constant 0 : i32
    return %arg0, %c0_i32, %arg1 : i32, i32, i32
  }
  func.func @transform_2(%arg0: i32, %arg1: i32) -> (i32, i32, i32) {
    %c0_i32 = arith.constant 0 : i32
    %c0_i32_0 = arith.constant 0 : i32
    return %arg0, %c0_i32, %arg1 : i32, i32, i32
  }
  func.func @transform_3(%arg0: i32, %arg1: i32) -> (i32, i32, i32) {
    %c0_i32 = arith.constant 0 : i32
    %c0_i32_0 = arith.constant 0 : i32
    return %arg0, %c0_i32, %arg1 : i32, i32, i32
  }
}

</mosaic_0001>

<bundles_post_ra>
// kernel: _lambda_.1
= control target key start
LH: loop header
LB: loop body
LE: loop exit
PB: predicated region body
PF: predicated region fallthrough
CT: control target
= control target key end

     0   :  { %s518_s12 = smov 0   ;;  %s520_s13 = smov 0   ;;  %s557_s0 = inlined_call_operand.vmem [shape: f32[2,4,256], index: 0, kind: input, shape index: {}]   ;;  %s558_s1 = inlined_call_operand.vmem [shape: f32[2,8,256], index: 1, kind: input, shape index: {}]   ;;  %s559_s2 = inlined_call_operand.vmem [shape: f32[2,4,256], index: 2, kind: input, shape index: {}]   ;;  %s560_s3 = inlined_call_operand.vmem [shape: f32[2,16,256], index: 3, kind: output, shape index: {}]  }
   0x1   :  { %s522_s14 = smov 0  }
   0x2 LB: > { %s25_s15 = sadd.s32 1, %s492_s13  ;;  %p433_p0 = scmp.ge.s32.totalorder %s496_s14, 1  ;;  %s496_s14 = sphi %s522_s14, %s13_s14   ;;  %s492_s13 = sphi %s520_s13, %s562_s13   ;;  %s488_s12 = sphi %s518_s12, %s561_s12  }
   0x3   : > { %p27_p1 = scmp.ge.s32.totalorder %s25_s15, 2  ;;  %p192_p2 = scmp.lt.s32.totalorder %s496_s14, 3 }
   0x5   : > { %s564_s15 = smov (%p27_p1, %s25_s15), 0  ;;  %p193_p3 = pnand %p433_p0, %p192_p2 }
   0x6   : > { %p243_p4 = scmp.lt.s32.totalorder (!%p193_p3), %s488_s12, 1 }
   0x7   : > { %196 = sbr.rel (%p193_p3) target bundleno = 21 (0x15), region = 32 }
   0xc   : > { %s566_s12 = smov (!%p243_p4, %s488_s12), 1 }
   0xd   : > { %s444_s16 = sshll.u32 %s566_s12, 3  ;;  %s447_s17 = sshll.u32 %s566_s12, 5 }
   0xe   : > { %s250_s20 = scalar_lea.vmem %s557_s0, %s444_s16  ;;  %s280_s23 = scalar_lea.vmem %s560_s3, %s447_s17 }
   0xf   : > { %v282_v0 = vld [vmem:[%s250_s20] sm:$0xff]  ;;  %s445_s24 = sshll.u32 %s566_s12, 4  ;;  %s270_s27 = scalar_lea.vmem %s559_s2, %s444_s16 }
  0x10   : > { %286 = vst [vmem:[%s280_s23] sm:$0xf] %v282_v0  ;;  %v284_v1 = vcombine.high %v282_v0, %v282_v0  ;;  %s260_s30 = scalar_lea.vmem %s558_s1, %s445_s24  ;;  %v300_v2 = vld [vmem:[%s270_s27] sm:$0xff] }
  0x11   : > { %v288_v3 = vld [vmem:[%s260_s30] sm:$0xff]  ;;  %v289_v4 = vld [vmem:[%s260_s30 + $0x8] sm:$0xff]  ;;  %v302_v5 = vcombine.low %v300_v2, %v300_v2  ;;  %305 = vst [vmem:[%s280_s23 + $0x18] sm:$0xf0] %v300_v2 }
  0x12   : > { %287 = vst [vmem:[%s280_s23 + $0x8] sm:$0xf] %v284_v1  ;;  %v292_v6 = vrot.slane %v288_v3, 4  ;;  %v293_v7 = vrot.slane %v289_v4, 4 }
  0x13   : > { %304 = vst [vmem:[%s280_s23 + $0x10] sm:$0xf0] %v302_v5 }
  0x14   : > { %296 = vst [vmem:[%s280_s23 + $0x10] ss:$-12 sps:$4 sm:$0xff] %v292_v6   ;;  %297 = vst [vmem:[%s280_s23 + $0x18] ss:$-12 sps:$4 sm:$0xff] %v293_v7  }
  0x15 PF: > { %s13_s14 = sadd.s32 1, %s496_s14   ;;  %s561_s12 = smov %s492_s13 }
  0x16   : > { %p10_p5 = scmp.ge.s32.totalorder %s13_s14, 4   ;;  %s562_s13 = smov %s564_s15 }
  0x18   :  { %12 = sbr.rel (!%p10_p5) target bundleno = 2 (0x2), region = 68 }

</bundles_post_ra>
